<compile_context>
chip_gen: v6e
topology: v6e:2x2x1
jax: 0.10.0
libtpu: 0.0.40
codegen_flags: <defaults>
</compile_context>

<pallas_src>
import functools

import jax
import jax.numpy as jnp
from jax.experimental import pallas as pl
from jax.experimental.pallas import tpu as pltpu


def _cdiv(a, b):
    return -(-a // b)


def _round_up(n, m):
    return ((n + m - 1) // m) * m


def _recip(x):
    # EUP-routed reciprocal (keeps the divide off the VALU slot) + Newton-Raphson
    # refinement: one step suffices for a >=12-bit seed; the second costs 2 VALU
    # ops/elem and makes the result ~1 ulp regardless of the seed accuracy.
    r = pl.reciprocal(x, approx=True)
    r = r * (2.0 - x * r)
    r = r * (2.0 - x * r)
    return r


def _softrmax_kernel(x_ref, o_ref, *, natural_out):
    # x_ref: (tb, C) block in the natural (batch, class) layout.
    x = x_ref[...].astype(jnp.float32)
    # Lane-dense compute layout: classes on sublanes (C=10 pads to 16, only 1.6x
    # waste) and the big batch tile on the 128-wide lane axis.  The transpose is
    # XLU work that overlaps with the next tile's DMA.
    xt = jnp.transpose(x)                                   # (C, tb)
    sq1 = jnp.sum(xt * xt, axis=0, keepdims=True) + 1.0     # (1, tb): ||x_b||^2 + 1
    # sum_j (x_j - eye[i]_j)^2  ==  ||x||^2 - 2*x_i + 1
    dist = sq1 - 2.0 * xt                                    # (C, tb)
    # FP cancellation can drive dist to <= 0 for near-one-hot rows; the true value
    # is >= 0, so clamp to the smallest normal (NOT 0, which would give inf/inf=NaN).
    dist = jnp.maximum(dist, jnp.finfo(jnp.float32).tiny)
    nu = _recip(dist) + 1e-20                                # (C, tb), eps after recip
    inv_denom = _recip(jnp.sum(nu, axis=0, keepdims=True))   # (1, tb): one recip/column
    pos = nu * inv_denom                                     # (C, tb)
    if natural_out:
        o_ref[...] = jnp.transpose(pos).astype(o_ref.dtype)  # back to (tb, C)
    else:
        o_ref[...] = pos.astype(o_ref.dtype)                 # lane-major (C, tb)


def _pick_tile(B, *, tb_cap, min_steps):
    # Sublane granularity of the natural (tb, C) blocks is 8; a multiple of 128
    # additionally gives full lanes after the in-kernel transpose.
    if B <= 1024:
        return _round_up(B, 8)                       # one small tile
    n = max(min_steps, _cdiv(B, tb_cap))             # >= min_steps grid steps
    return min(_round_up(_cdiv(B, n), 128), _round_up(tb_cap, 128))


def softrmax(x, *, tb_cap=2048, min_steps=8, lane_major_out=False, out_dtype=None):
    """softRmax over the class axis.

    x: (B, C) float.  Returns (B, C) by default; with lane_major_out=True returns
    the class-major (C, B) layout and skips the output back-transpose (for callers
    that can consume it).  out_dtype (e.g. jnp.bfloat16) halves the store stream.
    """
    B, C = x.shape
    out_dtype = x.dtype if out_dtype is None else out_dtype

    tb = _pick_tile(B, tb_cap=tb_cap, min_steps=min_steps)
    grid_n = _cdiv(B, tb)
    Bp = grid_n * tb
    xp = x if Bp == B else jnp.pad(x, ((0, Bp - B), (0, 0)))  # zero rows -> finite, sliced off

    kernel = functools.partial(_softrmax_kernel, natural_out=not lane_major_out)
    if lane_major_out:
        out_shape = jax.ShapeDtypeStruct((C, Bp), out_dtype)
        out_spec = pl.BlockSpec((C, tb), lambda i: (0, i))
    else:
        out_shape = jax.ShapeDtypeStruct((Bp, C), out_dtype)
        out_spec = pl.BlockSpec((tb, C), lambda i: (i, 0))

    out = pl.pallas_call(
        kernel,
        out_shape=out_shape,
        grid=(grid_n,),
        in_specs=[pl.BlockSpec((tb, C), lambda i: (i, 0))],
        out_specs=out_spec,
        # Default Buffered(2) pipelining is kept on purpose (deeper only burns VMEM).
        compiler_params=pltpu.CompilerParams(dimension_semantics=("parallel",)),
    )(xp)

    if lane_major_out:
        return out[:, :B]
    return out[:B]


def softrmax_ref(x):
    # Pure-JAX reference mirroring the PyTorch loop (direct sum of squares).
    C = x.shape[1]
    e = jnp.eye(C, dtype=x.dtype)
    nu = jnp.stack(
        [1.0 / jnp.sum((x - e[i]) ** 2, axis=1) + 1e-20 for i in range(C)],
        axis=1,
    )
    return nu / jnp.sum(nu, axis=1, keepdims=True)


if __name__ == "__main__":
    key = jax.random.PRNGKey(0)
    C = 10  # fashion-MNIST classes
    k1, k2, k3 = jax.random.split(key, 3)

    # Case 1: random batch, natural (B, C) -> (B, C) contract.
    x1 = jax.random.normal(k1, (128, C), dtype=jnp.float32)
    out1 = jax.block_until_ready(softrmax(x1))
    ref1 = softrmax_ref(x1)
    assert out1.shape == (128, C) and out1.dtype == jnp.float32
    assert jnp.allclose(out1, ref1, rtol=1e-5, atol=1e-6), "mismatch (random)"

    # Case 2: adversarial near-one-hot rows (cancellation / clamp regime).
    labels = jnp.arange(64) % C
    x2 = (jax.nn.one_hot(labels, C, dtype=jnp.float32)
          + 3e-3 * jax.random.normal(k2, (64, C), dtype=jnp.float32))
    out2 = jax.block_until_ready(softrmax(x2))
    ref2 = softrmax_ref(x2)
    assert bool(jnp.all(jnp.isfinite(out2))), "non-finite output on near-one-hot rows"
    assert jnp.allclose(out2, ref2, rtol=1e-5, atol=1e-6), "mismatch (near-one-hot)"

    # Case 3: multi-tile grid with a ragged batch (exercises tiling + padding rule).
    x3 = jax.random.normal(k3, (2500, C), dtype=jnp.float32)
    out3 = jax.block_until_ready(softrmax(x3))
    ref3 = softrmax_ref(x3)
    assert out3.shape == (2500, C)
    assert jnp.allclose(out3, ref3, rtol=1e-5, atol=1e-6), "mismatch (multi-tile)"

    # Lane-major contract (review option (a)): class-major (C, B) output, no back-transpose.
    out1_t = jax.block_until_ready(softrmax(x1, lane_major_out=True))
    assert out1_t.shape == (C, 128)
    assert jnp.allclose(out1_t, ref1.T, rtol=1e-5, atol=1e-6), "mismatch (lane-major)"

    print("KERNEL_OK")
</pallas_src>

<mosaic_0001>
module attributes {stable_mosaic.version = 11 : i64} {
  func.func @_softrmax_kernel(%arg0: i32, %arg1: memref<128x10xf32, #tpu.memory_space<vmem>>, %arg2: memref<128x10xf32, #tpu.memory_space<vmem>>) attributes {dimension_semantics = [#tpu.dimension_semantics<parallel>], iteration_bounds = array<i64: 1>, scalar_prefetch = 0 : i64, scratch_operands = 0 : i64, tpu.core_type = #tpu.core_type<tc>, window_params = [{transform_indices = @transform_0, window_bounds = array<i64: 128, 10>}, {transform_indices = @transform_1, window_bounds = array<i64: 128, 10>}]} {
    %c0 = arith.constant 0 : index
    %c0_0 = arith.constant 0 : index
    %0 = vector.load %arg1[%c0, %c0_0] : memref<128x10xf32, #tpu.memory_space<vmem>>, vector<128x10xf32>
    %1 = tpu.transpose %0, [1, 0] : vector<128x10xf32> -> vector<10x128xf32>
    %2 = arith.mulf %1, %1 : vector<10x128xf32>
    %cst = arith.constant dense<0.000000e+00> : vector<128xf32>
    %3 = vector.multi_reduction <add>, %2, %cst [0] : vector<10x128xf32> to vector<128xf32>
    %4 = vector.shape_cast %3 : vector<128xf32> to vector<1x128xf32>
    %cst_1 = arith.constant 1.000000e+00 : f32
    %5 = vector.broadcast %cst_1 : f32 to vector<1x128xf32>
    %6 = arith.addf %4, %5 : vector<1x128xf32>
    %cst_2 = arith.constant 2.000000e+00 : f32
    %7 = vector.broadcast %cst_2 : f32 to vector<10x128xf32>
    %8 = arith.mulf %7, %1 : vector<10x128xf32>
    %9 = vector.broadcast %6 : vector<1x128xf32> to vector<10x128xf32>
    %10 = arith.subf %9, %8 : vector<10x128xf32>
    %cst_3 = arith.constant 1.17549435E-38 : f32
    %11 = vector.broadcast %cst_3 : f32 to vector<10x128xf32>
    %12 = arith.maximumf %10, %11 : vector<10x128xf32>
    %13 = tpu.reciprocal %12 {approx = true} : vector<10x128xf32> -> vector<10x128xf32>
    %14 = arith.mulf %12, %13 : vector<10x128xf32>
    %cst_4 = arith.constant 2.000000e+00 : f32
    %15 = vector.broadcast %cst_4 : f32 to vector<10x128xf32>
    %16 = arith.subf %15, %14 : vector<10x128xf32>
    %17 = arith.mulf %13, %16 : vector<10x128xf32>
    %18 = arith.mulf %12, %17 : vector<10x128xf32>
    %cst_5 = arith.constant 2.000000e+00 : f32
    %19 = vector.broadcast %cst_5 : f32 to vector<10x128xf32>
    %20 = arith.subf %19, %18 : vector<10x128xf32>
    %21 = arith.mulf %17, %20 : vector<10x128xf32>
    %cst_6 = arith.constant 9.99999968E-21 : f32
    %22 = vector.broadcast %cst_6 : f32 to vector<10x128xf32>
    %23 = arith.addf %21, %22 : vector<10x128xf32>
    %cst_7 = arith.constant dense<0.000000e+00> : vector<128xf32>
    %24 = vector.multi_reduction <add>, %23, %cst_7 [0] : vector<10x128xf32> to vector<128xf32>
    %25 = vector.shape_cast %24 : vector<128xf32> to vector<1x128xf32>
    %26 = tpu.reciprocal %25 {approx = true} : vector<1x128xf32> -> vector<1x128xf32>
    %27 = arith.mulf %25, %26 : vector<1x128xf32>
    %cst_8 = arith.constant 2.000000e+00 : f32
    %28 = vector.broadcast %cst_8 : f32 to vector<1x128xf32>
    %29 = arith.subf %28, %27 : vector<1x128xf32>
    %30 = arith.mulf %26, %29 : vector<1x128xf32>
    %31 = arith.mulf %25, %30 : vector<1x128xf32>
    %cst_9 = arith.constant 2.000000e+00 : f32
    %32 = vector.broadcast %cst_9 : f32 to vector<1x128xf32>
    %33 = arith.subf %32, %31 : vector<1x128xf32>
    %34 = arith.mulf %30, %33 : vector<1x128xf32>
    %35 = vector.broadcast %34 : vector<1x128xf32> to vector<10x128xf32>
    %36 = arith.mulf %23, %35 : vector<10x128xf32>
    %37 = tpu.transpose %36, [1, 0] : vector<10x128xf32> -> vector<128x10xf32>
    %c0_10 = arith.constant 0 : index
    %c0_11 = arith.constant 0 : index
    %38 = vector.load %arg2[%c0_10, %c0_11] : memref<128x10xf32, #tpu.memory_space<vmem>>, vector<128x10xf32>
    tpu.vector_store %arg2[%c0_10, %c0_11], %37 {strides = array<i32>} : memref<128x10xf32, #tpu.memory_space<vmem>>, vector<128x10xf32>,
    return
  }
  func.func @transform_0(%arg0: i32) -> (i32, i32) {
    %c0_i32 = arith.constant 0 : i32
    %c0_i32_0 = arith.constant 0 : i32
    return %arg0, %c0_i32 : i32, i32
  }
  func.func @transform_1(%arg0: i32) -> (i32, i32) {
    %c0_i32 = arith.constant 0 : i32
    %c0_i32_0 = arith.constant 0 : i32
    return %arg0, %c0_i32 : i32, i32
  }
}

</mosaic_0001>

<bundles_post_ra>
// kernel: tpu_custom_call.1
= control target key start
LH: loop header
LB: loop body
LE: loop exit
PB: predicated region body
PF: predicated region fallthrough
CT: control target
= control target key end

     0   :  { %vm58_vm0 = vcmask 1041408   ;;  %vm139_vm1 = vcmask 80896   ;;  %s291_s0 = inlined_call_operand.vmem [shape: f32[128,10], index: 0, kind: input, shape index: {}]   ;;  %s292_s1 = inlined_call_operand.vmem [shape: f32[128,10], index: 1, kind: output, shape index: {}]  }
   0x1   :  { %v8_v0 = vld [vmem:[%s291_s0] sm:$0xff]  ;;  %v9_v1 = vld [vmem:[%s291_s0 + $0x8] sm:$0xff]  ;;  %v10_v2 = vld [vmem:[%s291_s0 + $0x10] sm:$0xff] }
   0x2   :  { %24 = vxpose.xlu0.b32.start [1/16] (narrow) %v8_v0, 16  ;;  %v11_v3 = vld [vmem:[%s291_s0 + $0x18] sm:$0xff]  ;;  %v12_v4 = vld [vmem:[%s291_s0 + $0x20] sm:$0xff]  ;;  %v13_v5 = vld [vmem:[%s291_s0 + $0x28] sm:$0xff] }
   0x3   :  { %v14_v6 = vld [vmem:[%s291_s0 + $0x30] sm:$0xff]  ;;  %v15_v7 = vld [vmem:[%s291_s0 + $0x38] sm:$0xff]  ;;  %v16_v8 = vld [vmem:[%s291_s0 + $0x40] sm:$0xff] }
   0x4   :  { %v17_v9 = vld [vmem:[%s291_s0 + $0x48] sm:$0xff]  ;;  %v18_v10 = vld [vmem:[%s291_s0 + $0x50] sm:$0xff]  ;;  %v19_v11 = vld [vmem:[%s291_s0 + $0x58] sm:$0xff] }
   0x5   :  { %v20_v12 = vld [vmem:[%s291_s0 + $0x60] sm:$0xff]  ;;  %v21_v13 = vld [vmem:[%s291_s0 + $0x68] sm:$0xff]  ;;  %v22_v14 = vld [vmem:[%s291_s0 + $0x70] sm:$0xff] }
   0x6   :  { %25 = vxpose.xlu0.b32.cont [2/16] (narrow) %v9_v1, 16  ;;  %v23_v15 = vld [vmem:[%s291_s0 + $0x78] sm:$0xff] }
   0xa   :  { %26 = vxpose.xlu0.b32.cont [3/16] (narrow) %v10_v2, 16 }
   0xe   :  { %27 = vxpose.xlu0.b32.cont [4/16] (narrow) %v11_v3, 16 }
  0x12   :  { %28 = vxpose.xlu0.b32.cont [5/16] (narrow) %v12_v4, 16 }
  0x16   :  { %29 = vxpose.xlu0.b32.cont [6/16] (narrow) %v13_v5, 16 }
  0x1a   :  { %30 = vxpose.xlu0.b32.cont [7/16] (narrow) %v14_v6, 16 }
  0x1e   :  { %31 = vxpose.xlu0.b32.cont [8/16] (narrow) %v15_v7, 16 }
  0x22   :  { %32 = vxpose.xlu0.b32.cont [9/16] (narrow) %v16_v8, 16 }
  0x26   :  { %33 = vxpose.xlu0.b32.cont [10/16] (narrow) %v17_v9, 16 }
  0x2a   :  { %34 = vxpose.xlu0.b32.cont [11/16] (narrow) %v18_v10, 16 }
  0x2e   :  { %35 = vxpose.xlu0.b32.cont [12/16] (narrow) %v19_v11, 16 }
  0x32   :  { %36 = vxpose.xlu0.b32.cont [13/16] (narrow) %v20_v12, 16 }
  0x36   :  { %37 = vxpose.xlu0.b32.cont [14/16] (narrow) %v21_v13, 16 }
  0x3a   :  { %38 = vxpose.xlu0.b32.cont [15/16] (narrow) %v22_v14, 16 }
  0x3e   :  { %39 = vxpose.xlu0.b32.end [16/16] (narrow) %v23_v15, 16 }
  0x7e   :  { %v40_v16 = vpop.trf.xlu0 }
  0x7f   :  { %v56_v19 = vmul.f32 %v40_v16, %v40_v16  ;;  %v68_v28 = vmul.f32 2.0, %v40_v16 }
  0x82   :  { %v41_v17 = vpop.trf.xlu0 }
  0x83   :  { %v57_v18 = vmul.f32 %v41_v17, %v41_v17  ;;  %v69_v30 = vmul.f32 2.0, %v41_v17 }
  0x85   :  { %v59_v20 = vsel %vm58_vm0, %v57_v18, 0.0 }
  0x86   :  { %v60_v21 = vadd.f32 %v59_v20, %v56_v19 }
  0x88   :  { %v61_v22 = vrot.slane %v60_v21, 4 }
  0x8a   :  { %v62_v23 = vadd.f32 %v61_v22, %v60_v21 }
  0x8c   :  { %v63_v24 = vrot.slane %v62_v23, 2 }
  0x8e   :  { %v64_v25 = vadd.f32 %v63_v24, %v62_v23 }
  0x90   :  { %v65_v26 = vrot.slane %v64_v25, 1 }
  0x92   :  { %v66_v27 = vadd.f32 %v65_v26, %v64_v25 }
  0x94   :  { %v67_v29 = vadd.f32 1.0, %v66_v27 }
  0x96   :  { %v70_v31 = vsub.f32 %v67_v29, %v68_v28  ;;  %v71_v32 = vsub.f32 %v67_v29, %v69_v30 }
  0x98   :  { %v72_v33 = vmax.f32 %v70_v31, 1.1754944e-38  ;;  %v73_v34 = vmax.f32 %v71_v32, 1.1754944e-38 }
  0x9a   :  { %161 = vrcp.f32 %v72_v33 }
  0x9b   :  { %163 = vrcp.f32 %v73_v34 }
  0xa7   :  { %v162_v35 = vpop.eup %161 }
  0xa8   :  { %v164_v36 = vpop.eup %163  ;;  %v76_v37 = vmul.f32 %v162_v35, %v72_v33 }
  0xa9   :  { %v77_v38 = vmul.f32 %v164_v36, %v73_v34 }
  0xaa   :  { %v78_v39 = vsub.f32 2.0, %v76_v37 }
  0xab   :  { %v79_v40 = vsub.f32 2.0, %v77_v38 }
  0xac   :  { %v80_v41 = vmul.f32 %v162_v35, %v78_v39 }
  0xad   :  { %v81_v42 = vmul.f32 %v164_v36, %v79_v40 }
  0xae   :  { %v82_v43 = vmul.f32 %v80_v41, %v72_v33 }
  0xaf   :  { %v83_v44 = vmul.f32 %v81_v42, %v73_v34 }
  0xb0   :  { %v84_v45 = vsub.f32 2.0, %v82_v43 }
  0xb1   :  { %v85_v46 = vsub.f32 2.0, %v83_v44 }
  0xb2   :  { %v86_v47 = vmul.f32 %v84_v45, %v80_v41 }
  0xb3   :  { %v87_v48 = vmul.f32 %v85_v46, %v81_v42 }
  0xb4   :  { %v88_v49 = vadd.f32 1e-20, %v86_v47 }
  0xb5   :  { %v89_v50 = vadd.f32 1e-20, %v87_v48 }
  0xb7   :  { %v90_v51 = vsel %vm58_vm0, %v89_v50, 0.0 }
  0xb8   :  { %v91_v52 = vadd.f32 %v90_v51, %v88_v49 }
  0xba   :  { %v92_v53 = vrot.slane %v91_v52, 4 }
  0xbc   :  { %v93_v54 = vadd.f32 %v92_v53, %v91_v52 }
  0xbe   :  { %v94_v55 = vrot.slane %v93_v54, 2 }
  0xc0   :  { %v95_v56 = vadd.f32 %v94_v55, %v93_v54 }
  0xc2   :  { %v96_v57 = vrot.slane %v95_v56, 1 }
  0xc4   :  { %v97_v58 = vadd.f32 %v96_v57, %v95_v56 }
  0xc6   :  { %165 = vrcp.f32 %v97_v58 }
  0xd3   :  { %v166_v59 = vpop.eup %165 }
  0xd4   :  { %v99_v60 = vmul.f32 %v166_v59, %v97_v58 }
  0xd6   :  { %v100_v61 = vsub.f32 2.0, %v99_v60 }
  0xd8   :  { %v101_v62 = vmul.f32 %v166_v59, %v100_v61 }
  0xda   :  { %v102_v63 = vmul.f32 %v101_v62, %v97_v58 }
  0xdc   :  { %v103_v0 = vsub.f32 2.0, %v102_v63 }
  0xde   :  { %v104_v1 = vmul.f32 %v103_v0, %v101_v62 }
  0xe0   :  { %v105_v2 = vmul.f32 %v104_v1, %v88_v49  ;;  %v106_v3 = vmul.f32 %v104_v1, %v89_v50 }
  0xe2   :  { %107 = vxpose.xlu1.b32.start [1/2] (short) %v105_v2, 128 }
  0xe6   :  { %108 = vxpose.xlu1.b32.end [2/2] (short) %v106_v3, 128 }
 0x15e   :  { %v123_v4 = vpop.trf.xlu1 }
 0x15f   :  { %140 = vst.msk [vmem:[%s292_s1] sm:$0xff] %vm139_vm1, %v123_v4 }
 0x162   :  { %v124_v5 = vpop.trf.xlu1 }
 0x163   :  { %141 = vst.msk [vmem:[%s292_s1 + $0x8] sm:$0xff] %vm139_vm1, %v124_v5 }
 0x166   :  { %v125_v6 = vpop.trf.xlu1 }
 0x167   :  { %142 = vst.msk [vmem:[%s292_s1 + $0x10] sm:$0xff] %vm139_vm1, %v125_v6 }
 0x16a   :  { %v126_v7 = vpop.trf.xlu1 }
 0x16b   :  { %143 = vst.msk [vmem:[%s292_s1 + $0x18] sm:$0xff] %vm139_vm1, %v126_v7 }
 0x16e   :  { %v127_v8 = vpop.trf.xlu1 }
 0x16f   :  { %144 = vst.msk [vmem:[%s292_s1 + $0x20] sm:$0xff] %vm139_vm1, %v127_v8 }
 0x172   :  { %v128_v9 = vpop.trf.xlu1 }
 0x173   :  { %145 = vst.msk [vmem:[%s292_s1 + $0x28] sm:$0xff] %vm139_vm1, %v128_v9 }
 0x176   :  { %v129_v10 = vpop.trf.xlu1 }
 0x177   :  { %146 = vst.msk [vmem:[%s292_s1 + $0x30] sm:$0xff] %vm139_vm1, %v129_v10 }
 0x17a   :  { %v130_v11 = vpop.trf.xlu1 }
 0x17b   :  { %147 = vst.msk [vmem:[%s292_s1 + $0x38] sm:$0xff] %vm139_vm1, %v130_v11 }
 0x17e   :  { %v131_v12 = vpop.trf.xlu1 }
 0x17f   :  { %148 = vst.msk [vmem:[%s292_s1 + $0x40] sm:$0xff] %vm139_vm1, %v131_v12 }
 0x182   :  { %v132_v13 = vpop.trf.xlu1 }
 0x183   :  { %149 = vst.msk [vmem:[%s292_s1 + $0x48] sm:$0xff] %vm139_vm1, %v132_v13 }
 0x186   :  { %v133_v14 = vpop.trf.xlu1 }
 0x187   :  { %150 = vst.msk [vmem:[%s292_s1 + $0x50] sm:$0xff] %vm139_vm1, %v133_v14 }
 0x18a   :  { %v134_v15 = vpop.trf.xlu1 }
 0x18b   :  { %151 = vst.msk [vmem:[%s292_s1 + $0x58] sm:$0xff] %vm139_vm1, %v134_v15 }
 0x18e   :  { %v135_v16 = vpop.trf.xlu1 }
 0x18f   :  { %152 = vst.msk [vmem:[%s292_s1 + $0x60] sm:$0xff] %vm139_vm1, %v135_v16 }
 0x192   :  { %v136_v17 = vpop.trf.xlu1 }
 0x193   :  { %153 = vst.msk [vmem:[%s292_s1 + $0x68] sm:$0xff] %vm139_vm1, %v136_v17 }
 0x196   :  { %v137_v18 = vpop.trf.xlu1 }
 0x197   :  { %154 = vst.msk [vmem:[%s292_s1 + $0x70] sm:$0xff] %vm139_vm1, %v137_v18 }
 0x19a   :  { %v138_v19 = vpop.trf.xlu1 }
 0x19b   :  { %155 = vst.msk [vmem:[%s292_s1 + $0x78] sm:$0xff] %vm139_vm1, %v138_v19 }

</bundles_post_ra>
